<compile_context>
chip_gen: v7x
topology: tpu7x:2x2x1
jax: 0.10.0
libtpu: 0.0.40
codegen_flags: <defaults>
</compile_context>

<pallas_src>
import functools
import math

import jax
import jax.numpy as jnp
from jax.experimental import pallas as pl
from jax.experimental.pallas import tpu as pltpu


def _affine_kernel(x_ref, stats_ref, o_ref):
    # y = x * scale + shift ; stats_ref is (2, tf) f32: row 0 = scale, row 1 = shift.
    x = x_ref[...].astype(jnp.float32)
    scale = stats_ref[0:1, :]
    shift = stats_ref[1:2, :]
    o_ref[...] = (x * scale + shift).astype(o_ref.dtype)


def _cdiv(a, b):
    return -(-a // b)


def _lane_util(width):
    # Fraction of the 128-lane vreg width actually used by rows of `width`.
    return width / (128.0 * _cdiv(width, 128))


def _pick_fold(B, F):
    """Largest-utilization fold factor g that divides B (always zero-copy)."""
    r = 128 // math.gcd(F, 128)  # minimal fold factor for full lane density
    best_g, best_u = 1, _lane_util(F)
    for g in range(2, r + 1):
        if B % g == 0:
            u = _lane_util(g * F)
            if u > best_u:
                best_g, best_u = g, u
    return best_g


def _vmem_capacity_bytes():
    try:
        return int(pltpu.get_tpu_info().vmem_capacity_bytes)
    except Exception:
        return 64 * 1024 * 1024  # v7x-safe fallback


@functools.partial(jax.jit, static_argnames=("denormalize", "force_pallas"))
def continuous_feature_normalizer(x, means, stds, denormalize=False,
                                  force_pallas=False):
    """x: [B, F]; means, stds: [F] (or [1, F]). Returns [B, F] in x.dtype."""
    B, F = x.shape
    means32 = jnp.reshape(means, (F,)).astype(jnp.float32)
    stds32 = jnp.reshape(stds, (F,)).astype(jnp.float32)

    # Precompute the affine form once (F elements only, not the streamed data).
    if denormalize:
        scale = stds32                      # stds * x + means
        shift = means32
    else:
        scale = 1.0 / stds32                # (x - means) / stds
        shift = -means32 * scale

    # Tiny-input fast path: XLA fusion beats fixed pallas_call/DMA overhead.
    if (not force_pallas) and (B * F < (1 << 16)):
        y = x.astype(jnp.float32) * scale[None, :] + shift[None, :]
        return y.astype(x.dtype)

    # ---- Lane-dense folding by a divisor of B: always a zero-copy reshape. --
    g = _pick_fold(B, F)
    Bf, Ff = B // g, g * F
    x_in = x.reshape(Bf, Ff)
    stats = jnp.stack([jnp.tile(scale, (g,)),
                       jnp.tile(shift, (g,))])          # (2, Ff) f32

    itemsize = jnp.dtype(x.dtype).itemsize
    sub = max(8, 32 // itemsize)            # sublane tile: 8 f32, 16 bf16, 32 int8

    # ---- Lane tile: keep blocks in the multi-MiB sweet spot for huge Ff. ----
    MAX_TF = 16384
    if Ff > MAX_TF:
        tf = MAX_TF if Ff % 128 == 0 else (MAX_TF // 128) * 128
    else:
        tf = Ff

    # ---- Generation-aware VMEM budget (dtype-aware block sizing). ----------
    vmem_cap = _vmem_capacity_bytes()                    # 128 MiB v5e/v6e, 64 MiB v7x
    vmem_limit = min(vmem_cap * 3 // 4, 100 * 1024 * 1024)   # ~96 MiB / 48 MiB
    buf_budget = vmem_limit * 2 // 3                         # ~64 MiB / 32 MiB
    # 2 double-buffered streamed blocks (in + out) of x.dtype; stats negligible.
    max_tb = buf_budget // (4 * tf * itemsize)
    max_tb = max(sub, (max_tb // sub) * sub)

    # ---- Batch tile: >=2 (even) steps for large inputs -> megacore sharding.
    min_steps = 2 if Bf >= 2 * sub else 1
    steps = max(min_steps, _cdiv(Bf, max_tb))
    if steps > 1 and steps % 2:
        steps += 1
    tb = _cdiv(_cdiv(Bf, steps), sub) * sub
    if tb >= Bf:
        tb = Bf                                          # full-dim block

    grid = (_cdiv(Bf, tb), _cdiv(Ff, tf))                # ragged tiles are masked

    out = pl.pallas_call(
        _affine_kernel,
        out_shape=jax.ShapeDtypeStruct((Bf, Ff), x.dtype),
        grid_spec=pl.GridSpec(
            grid=grid,
            in_specs=[
                pl.BlockSpec((tb, tf), lambda i, j: (i, j)),
                pl.BlockSpec((2, tf), lambda i, j: (0, j)),
            ],
            out_specs=pl.BlockSpec((tb, tf), lambda i, j: (i, j)),
        ),
        compiler_params=pltpu.CompilerParams(
            dimension_semantics=("parallel", "parallel"),
            vmem_limit_bytes=int(vmem_limit),
        ),
    )(x_in, stats)

    # Un-fold: pure dimension split of a row-major array (free), never a slice.
    return out.reshape(B, F)


if __name__ == "__main__":
    key = jax.random.PRNGKey(0)
    k_x, k_m, k_s, k_x2, k_m2, k_s2, k_x3 = jax.random.split(key, 7)

    # Small shapes consistent with the module: batch of transactions x features.
    B, F = 8, 32
    x = jax.random.normal(k_x, (B, F), dtype=jnp.float32) * 3.0 + 1.5
    t_means = jax.random.normal(k_m, (F,), dtype=jnp.float32)
    t_stds = jax.random.uniform(k_s, (F,), dtype=jnp.float32, minval=0.5, maxval=2.0)

    # Normalize (force the Pallas path so the kernel is exercised).
    y = continuous_feature_normalizer(x, t_means, t_stds, denormalize=False,
                                      force_pallas=True)
    y = jax.block_until_ready(y)
    y_ref = (x - t_means[None, :]) / t_stds[None, :]
    assert jnp.allclose(y, y_ref, rtol=1e-5, atol=1e-5), "normalize mismatch"

    # Denormalize (round trip).
    x_back = continuous_feature_normalizer(y, t_means, t_stds, denormalize=True,
                                           force_pallas=True)
    x_back = jax.block_until_ready(x_back)
    x_back_ref = t_stds[None, :] * y + t_means[None, :]
    assert jnp.allclose(x_back, x_back_ref, rtol=1e-5, atol=1e-5), "denormalize mismatch"
    assert jnp.allclose(x_back, x, rtol=1e-4, atol=1e-4), "round-trip mismatch"

    # Ragged batch, F not dividing 128, no fold factor divides B (B=7*19):
    # exercises the unfolded + ragged-last-tile (masked) path, zero copies.
    B2, F2 = 133, 96
    x2 = jax.random.normal(k_x2, (B2, F2), dtype=jnp.float32) * 2.0 - 0.7
    m2 = jax.random.normal(k_m2, (F2,), dtype=jnp.float32)
    s2 = jax.random.uniform(k_s2, (F2,), dtype=jnp.float32, minval=0.5, maxval=2.0)
    y2 = continuous_feature_normalizer(x2, m2, s2, denormalize=False,
                                       force_pallas=True)
    y2 = jax.block_until_ready(y2)
    y2_ref = (x2 - m2[None, :]) / s2[None, :]
    assert jnp.allclose(y2, y2_ref, rtol=1e-5, atol=1e-5), "ragged normalize mismatch"

    # Partial-fold path: only g=2 divides B -> folded width 64 (best effort).
    B3, F3 = 10, 32
    x3 = jax.random.normal(k_x3, (B3, F3), dtype=jnp.float32)
    y3 = continuous_feature_normalizer(x3, t_means, t_stds, denormalize=False,
                                       force_pallas=True)
    y3 = jax.block_until_ready(y3)
    y3_ref = (x3 - t_means[None, :]) / t_stds[None, :]
    assert jnp.allclose(y3, y3_ref, rtol=1e-5, atol=1e-5), "partial-fold mismatch"

    # bf16 input: exercises dtype-aware sublane alignment / buffer budget.
    B4, F4 = 48, 128
    x4 = (jax.random.normal(k_x, (B4, F4), dtype=jnp.float32)).astype(jnp.bfloat16)
    m4 = jax.random.normal(k_m, (F4,), dtype=jnp.float32)
    s4 = jax.random.uniform(k_s, (F4,), dtype=jnp.float32, minval=0.5, maxval=2.0)
    y4 = continuous_feature_normalizer(x4, m4, s4, denormalize=False,
                                       force_pallas=True)
    y4 = jax.block_until_ready(y4)
    y4_ref = (x4.astype(jnp.float32) - m4[None, :]) / s4[None, :]
    assert jnp.allclose(y4.astype(jnp.float32), y4_ref, rtol=2e-2, atol=2e-2), \
        "bf16 normalize mismatch"

    print("KERNEL_OK")
</pallas_src>

<mosaic_0001>
module attributes {stable_mosaic.version = 11 : i64} {
  func.func @_affine_kernel(%arg0: i32, %arg1: i32, %arg2: memref<2x128xf32, #tpu.memory_space<vmem>>, %arg3: memref<2x128xf32, #tpu.memory_space<vmem>>, %arg4: memref<2x128xf32, #tpu.memory_space<vmem>>) attributes {dimension_semantics = [#tpu.dimension_semantics<parallel>, #tpu.dimension_semantics<parallel>], iteration_bounds = array<i64: 1, 1>, scalar_prefetch = 0 : i64, scratch_operands = 0 : i64, tpu.core_type = #tpu.core_type<tc>, window_params = [{transform_indices = @transform_0, window_bounds = array<i64: 2, 128>}, {transform_indices = @transform_1, window_bounds = array<i64: 2, 128>}, {transform_indices = @transform_2, window_bounds = array<i64: 2, 128>}]} {
    %c0 = arith.constant 0 : index
    %c0_0 = arith.constant 0 : index
    %0 = vector.load %arg2[%c0, %c0_0] : memref<2x128xf32, #tpu.memory_space<vmem>>, vector<2x128xf32>
    %c0_1 = arith.constant 0 : index
    %c0_2 = arith.constant 0 : index
    %1 = vector.load %arg3[%c0_1, %c0_2] : memref<2x128xf32, #tpu.memory_space<vmem>>, vector<1x128xf32>
    %c1 = arith.constant 1 : index
    %c0_3 = arith.constant 0 : index
    %2 = vector.load %arg3[%c1, %c0_3] : memref<2x128xf32, #tpu.memory_space<vmem>>, vector<1x128xf32>
    %3 = vector.broadcast %1 : vector<1x128xf32> to vector<2x128xf32>
    %4 = arith.mulf %0, %3 : vector<2x128xf32>
    %5 = vector.broadcast %2 : vector<1x128xf32> to vector<2x128xf32>
    %6 = arith.addf %4, %5 : vector<2x128xf32>
    %c0_4 = arith.constant 0 : index
    %c0_5 = arith.constant 0 : index
    %7 = vector.load %arg4[%c0_4, %c0_5] : memref<2x128xf32, #tpu.memory_space<vmem>>, vector<2x128xf32>
    tpu.vector_store %arg4[%c0_4, %c0_5], %6 {strides = array<i32>} : memref<2x128xf32, #tpu.memory_space<vmem>>, vector<2x128xf32>,
    return
  }
  func.func @transform_0(%arg0: i32, %arg1: i32) -> (i32, i32) {
    %c0_i32 = arith.constant 0 : i32
    return %arg0, %arg1 : i32, i32
  }
  func.func @transform_1(%arg0: i32, %arg1: i32) -> (i32, i32) {
    %c0_i32 = arith.constant 0 : i32
    %c0_i32_0 = arith.constant 0 : i32
    return %c0_i32, %arg1 : i32, i32
  }
  func.func @transform_2(%arg0: i32, %arg1: i32) -> (i32, i32) {
    %c0_i32 = arith.constant 0 : i32
    return %arg0, %arg1 : i32, i32
  }
}

</mosaic_0001>

<bundles_post_ra>
// kernel: tile.17
= control target key start
LH: loop header
LB: loop body
LE: loop exit
PB: predicated region body
PF: predicated region fallthrough
CT: control target
= control target key end

     0   :  { %s22_s0 = inlined_call_operand.vmem [shape: f32[32], index: 0, kind: input, shape index: {}]   ;;  %s23_s1 = inlined_call_operand.vmem [shape: f32[4,32], index: 1, kind: output, shape index: {}]  }
   0x1   :  { %v4_v0 = vld [vmem:[%s22_s0] ss:$0 sm:$0xff] }
   0x2   :  { %5 = vst [vmem:[%s23_s1] sm:$0xf] %v4_v0 }

// kernel: tile.19
= control target key start
LH: loop header
LB: loop body
LE: loop exit
PB: predicated region body
PF: predicated region fallthrough
CT: control target
= control target key end

     0   :  { %vm7_vm0 = vcmask 261120   ;;  %s37_s8 = smov 32   ;;  %s38_s9 = smov 64   ;;  %vm13_vm1 = vcmask 1048320   ;;  %vm19_vm2 = vcmask 785920   ;;  %vm25_vm3 = vcmask 523520   ;;  %s55_s0 = inlined_call_operand.vmem [shape: f32[4,32], index: 0, kind: input, shape index: {}]   ;;  %s56_s1 = inlined_call_operand.vmem [shape: f32[1,128], index: 1, kind: output, shape index: {}]  }
   0x1   :  { %v4_v0 = vld [vmem:[%s55_s0] sm:$0xf]  ;;  %s36_s0 = smov 96  }
   0x2   :  { %5 = vst [vmem:[#allocation1] sm:$0xf] %v4_v0 }
   0x9   :  { %v10_v1 = vld [vmem:[#allocation1 + $0x3] sm:$0x1]   ;;  %v22_v2 = vld [vmem:[#allocation1 + $0x1] sm:$0x1]   ;;  %v6_v3 = vld [vmem:[#allocation1] sm:$0x1]  }
   0xa   :  { %11 = vrot.lane.b32.xlu0 %v10_v1, %s36_s0  ;;  %23 = vrot.lane.b32.xlu1 %v22_v2, %s37_s8  ;;  %v16_v4 = vld [vmem:[#allocation1 + $0x2] sm:$0x1]   ;;  %8 = vst.msk [vmem:[#allocation0] sm:$0x1] %vm7_vm0, %v6_v3  }
   0xe   :  { %17 = vrot.lane.b32.xlu0 %v16_v4, %s38_s9 }
  0x7c   :  { %v12_v5 = vpop.permute.xlu0 %11   ;;  %v24_v6 = vpop.permute.xlu1 %23  }
  0x7d   :  { %14 = vst.msk [vmem:[#allocation0] sm:$0x1] %vm13_vm1, %v12_v5  }
  0x80   :  { %v18_v7 = vpop.permute.xlu0 %17  }
  0x81   :  { %20 = vst.msk [vmem:[#allocation0] sm:$0x1] %vm19_vm2, %v18_v7  }
  0x82   :  { %26 = vst.msk [vmem:[#allocation0] sm:$0x1] %vm25_vm3, %v24_v6  }
  0x89   :  { %v30_v8 = vld [vmem:[#allocation0] sm:$0x1] }
  0x8a   :  { %32 = vst [vmem:[%s56_s1] sm:$0x1] %v30_v8 }

// kernel: continuous_feature_normalizer.1
= control target key start
LH: loop header
LB: loop body
LE: loop exit
PB: predicated region body
PF: predicated region fallthrough
CT: control target
= control target key end

     0   :  { %s58_s0 = inlined_call_operand.vmem [shape: f32[2,128], index: 0, kind: input, shape index: {}]   ;;  %s59_s1 = inlined_call_operand.vmem [shape: f32[2,128], index: 1, kind: input, shape index: {}]   ;;  %s60_s2 = inlined_call_operand.vmem [shape: f32[2,128], index: 2, kind: output, shape index: {}]  }
   0x1   :  { %v11_v0 = vld [vmem:[%s58_s0] sm:$0x3] }
   0x2   :  { %v29_v1 = vld [vmem:[%s59_s1] ss:$0 sm:$0xff]  ;;  %v30_v2 = vld [vmem:[%s59_s1 + $0x1] ss:$0 sm:$0xff] }
   0x3   :  { %v18_v3 = vmul.f32 %v29_v1, %v11_v0 }
   0x5   :  { %v23_v4 = vadd.f32 %v30_v2, %v18_v3 }
   0x7   :  { %24 = vst [vmem:[%s60_s2] sm:$0x3] %v23_v4 }

</bundles_post_ra>
